<compile_context>
chip_gen: v7x
topology: tpu7x:2x2x1
jax: 0.10.0
libtpu: 0.0.40
codegen_flags: <defaults>
</compile_context>

<pallas_src>
import jax
import jax.numpy as jnp
from jax.experimental import pallas as pl
from jax.experimental.pallas import tpu as pltpu


def lstm_cell_kernel(xh_ref, c_ref, w_ref, b_ref, out_ref):
    """Fused LSTM cell step.

    xh_ref : (B, D_in + H)   matmul dtype (f32 or bf16), [x | h]
    c_ref  : (B, H)          f32 cell state
    w_ref  : (D_in + H, 4H)  matmul dtype, [W_in ; W_rec] stacked
    b_ref  : (1, 4H)         f32 bias with +1.0 folded into the forget chunk
    out_ref: (B, 2H)         f32 lane-dense slab [h_new | c_new]
    """
    H = c_ref.shape[1]

    # One MXU matmul, f32 accumulation; bias added in f32.
    z = jnp.dot(xh_ref[...], w_ref[...],
                preferred_element_type=jnp.float32) + b_ref[...]

    # Full-lane activation: tanh on the first H lanes (input activation),
    # sigmoid on the remaining 3H gate lanes. One tanh + one sigmoid at
    # full lane width instead of four H-lane sub-vreg EUP calls.
    lane = jax.lax.broadcasted_iota(jnp.int32, z.shape, dimension=1)
    act = jnp.where(lane < H, jnp.tanh(z), jax.nn.sigmoid(z))

    input_activation = act[:, 0 * H:1 * H]
    input_gate = act[:, 1 * H:2 * H]
    forget_gate = act[:, 2 * H:3 * H]   # +1.0 already folded into the bias
    output_gate = act[:, 3 * H:4 * H]

    new_cell = c_ref[...] * forget_gate + input_activation * input_gate
    new_h = jnp.tanh(new_cell) * output_gate

    # Lane-dense output slab: one (B, 2H) store instead of two (B, H) stores.
    out_ref[...] = jnp.concatenate([new_h, new_cell], axis=1)


def fuse_params(w_in, b_in, w_rec, hidden_size):
    """One-time parameter fusion: stack weights, fold forget-gate +1.0 bias."""
    w_cat = jnp.concatenate([w_in, w_rec], axis=0)                    # (D_in+H, 4H)
    b_cat = b_in.at[:, 2 * hidden_size:3 * hidden_size].add(1.0)      # (1, 4H)
    return w_cat, b_cat


def lstm_cell(x, h, c, w_cat, b_cat, *, matmul_dtype=jnp.float32):
    B, H = h.shape
    xh = jnp.concatenate([x, h], axis=1).astype(matmul_dtype)
    w = w_cat.astype(matmul_dtype)

    vmem = pl.BlockSpec(memory_space=pltpu.MemorySpace.VMEM)
    out = pl.pallas_call(
        lstm_cell_kernel,
        out_shape=jax.ShapeDtypeStruct((B, 2 * H), jnp.float32),
        in_specs=[vmem] * 4,
        out_specs=vmem,
    )(xh, c, w, b_cat)
    return out[:, :H], out[:, H:]


def lstm_cell_ref(x, h, c, w_in, b_in, w_rec, matmul_dtype=jnp.float32):
    # Pure-JAX reference mirroring the PyTorch forward (unfused params,
    # explicit +1.0 forget-gate offset).
    xm = x.astype(matmul_dtype)
    hm = h.astype(matmul_dtype)
    z = (jnp.dot(xm, w_in.astype(matmul_dtype),
                 preferred_element_type=jnp.float32)
         + jnp.dot(hm, w_rec.astype(matmul_dtype),
                   preferred_element_type=jnp.float32)
         + b_in)
    H = h.shape[1]
    i, ig, fg, og = z[:, :H], z[:, H:2 * H], z[:, 2 * H:3 * H], z[:, 3 * H:]
    input_activation = jnp.tanh(i)
    input_gate = jax.nn.sigmoid(ig)
    forget_gate = jax.nn.sigmoid(fg + 1.0)
    output_gate = jax.nn.sigmoid(og)
    new_cell = c * forget_gate + input_activation * input_gate
    new_h = jnp.tanh(new_cell) * output_gate
    return new_h, new_cell


def init_params(key, input_size, hidden_size):
    k1, k2, k3 = jax.random.split(key, 3)
    # xavier_uniform for input_map.weight (fan_in=input_size, fan_out=4*hidden)
    limit = jnp.sqrt(6.0 / (input_size + 4 * hidden_size))
    w_in = jax.random.uniform(k1, (input_size, 4 * hidden_size),
                              jnp.float32, -limit, limit)
    # uniform(-0.1, 0.1) for input_map.bias
    b_in = jax.random.uniform(k2, (1, 4 * hidden_size), jnp.float32, -0.1, 0.1)
    # orthogonal-ish init for recurrent_map.weight via QR
    a = jax.random.normal(k3, (4 * hidden_size, hidden_size), jnp.float32)
    q, _ = jnp.linalg.qr(a)               # (4H, H) with orthonormal columns
    w_rec = q.T.astype(jnp.float32)       # (H, 4H)
    return w_in, b_in, w_rec


if __name__ == "__main__":
    B, D_IN, HID = 8, 16, 32

    key = jax.random.PRNGKey(0)
    kx, kh, kc, kp = jax.random.split(key, 4)
    x = jax.random.normal(kx, (B, D_IN), jnp.float32)
    h0 = jax.random.normal(kh, (B, HID), jnp.float32)
    c0 = jax.random.normal(kc, (B, HID), jnp.float32)
    w_in, b_in, w_rec = init_params(kp, D_IN, HID)
    w_cat, b_cat = fuse_params(w_in, b_in, w_rec, HID)

    # Exact f32 reference (matches the PyTorch forward).
    h_ref, c_ref = lstm_cell_ref(x, h0, c0, w_in, b_in, w_rec)

    # 1) f32 matmul path — must match the reference tightly.
    h1, c1 = lstm_cell(x, h0, c0, w_cat, b_cat, matmul_dtype=jnp.float32)
    jax.block_until_ready((h1, c1))
    assert jnp.allclose(h1, h_ref, atol=1e-5, rtol=1e-5)
    assert jnp.allclose(c1, c_ref, atol=1e-5, rtol=1e-5)

    # 2) bf16 matmul path (MXU-native on v5e/v6e/v7x); gate math stays f32.
    h2, c2 = lstm_cell(x, h0, c0, w_cat, b_cat, matmul_dtype=jnp.bfloat16)
    jax.block_until_ready((h2, c2))
    h_ref16, c_ref16 = lstm_cell_ref(x, h0, c0, w_in, b_in, w_rec,
                                     matmul_dtype=jnp.bfloat16)
    # Apples-to-apples vs a bf16-cast reference: only accumulation order differs.
    assert jnp.allclose(h2, h_ref16, atol=1e-2, rtol=1e-2)
    assert jnp.allclose(c2, c_ref16, atol=1e-2, rtol=1e-2)
    # Quantization error vs the exact f32 reference stays small (bounded outputs).
    assert jnp.allclose(h2, h_ref, atol=1e-1, rtol=1e-1)

    print("KERNEL_OK")
</pallas_src>

<mosaic_0001>
module attributes {stable_mosaic.version = 11 : i64} {
  func.func @lstm_cell_kernel(%arg0: memref<8x48xf32, #tpu.memory_space<vmem>>, %arg1: memref<8x32xf32, #tpu.memory_space<vmem>>, %arg2: memref<48x128xf32, #tpu.memory_space<vmem>>, %arg3: memref<1x128xf32, #tpu.memory_space<vmem>>, %arg4: memref<8x64xf32, #tpu.memory_space<vmem>>) attributes {dimension_semantics = [], scalar_prefetch = 0 : i64, scratch_operands = 0 : i64, tpu.core_type = #tpu.core_type<tc>} {
    %c0 = arith.constant 0 : index
    %c0_0 = arith.constant 0 : index
    %0 = vector.load %arg0[%c0, %c0_0] : memref<8x48xf32, #tpu.memory_space<vmem>>, vector<8x48xf32>
    %c0_1 = arith.constant 0 : index
    %c0_2 = arith.constant 0 : index
    %1 = vector.load %arg2[%c0_1, %c0_2] : memref<48x128xf32, #tpu.memory_space<vmem>>, vector<48x128xf32>
    %cst = arith.constant dense<0.000000e+00> : vector<8x128xf32>
    %2 = tpu.matmul %0, %1, %cst {dimension_numbers = #tpu.dot_dimension_numbers<[1], [0], [0], [1], [0, 0, 1, 1], [], []>} : vector<8x48xf32>, vector<48x128xf32>, vector<8x128xf32> -> vector<8x128xf32>
    %c0_3 = arith.constant 0 : index
    %c0_4 = arith.constant 0 : index
    %3 = vector.load %arg3[%c0_3, %c0_4] : memref<1x128xf32, #tpu.memory_space<vmem>>, vector<1x128xf32>
    %4 = vector.broadcast %3 : vector<1x128xf32> to vector<8x128xf32>
    %5 = arith.addf %2, %4 : vector<8x128xf32>
    %6 = tpu.iota {dimensions = array<i32: 1>} : vector<8x128xi32>
    %c32_i32 = arith.constant 32 : i32
    %7 = vector.broadcast %c32_i32 : i32 to vector<8x128xi32>
    %8 = arith.cmpi slt, %6, %7 : vector<8x128xi32>
    %9 = math.tanh %5 : vector<8x128xf32>
    %10 = arith.negf %5 : vector<8x128xf32>
    %11 = math.exp %10 : vector<8x128xf32>
    %cst_5 = arith.constant 1.000000e+00 : f32
    %12 = vector.broadcast %cst_5 : f32 to vector<8x128xf32>
    %13 = arith.addf %12, %11 : vector<8x128xf32>
    %14 = arith.divf %12, %13 : vector<8x128xf32>
    %15 = arith.select %8, %9, %14 : vector<8x128xi1>, vector<8x128xf32>
    %16 = vector.extract_strided_slice %15 {offsets = [0, 0], sizes = [8, 32], strides = [1, 1]} : vector<8x128xf32> to vector<8x32xf32>
    %17 = vector.extract_strided_slice %15 {offsets = [0, 32], sizes = [8, 32], strides = [1, 1]} : vector<8x128xf32> to vector<8x32xf32>
    %18 = vector.extract_strided_slice %15 {offsets = [0, 64], sizes = [8, 32], strides = [1, 1]} : vector<8x128xf32> to vector<8x32xf32>
    %19 = vector.extract_strided_slice %15 {offsets = [0, 96], sizes = [8, 32], strides = [1, 1]} : vector<8x128xf32> to vector<8x32xf32>
    %c0_6 = arith.constant 0 : index
    %c0_7 = arith.constant 0 : index
    %20 = vector.load %arg1[%c0_6, %c0_7] : memref<8x32xf32, #tpu.memory_space<vmem>>, vector<8x32xf32>
    %21 = arith.mulf %20, %18 : vector<8x32xf32>
    %22 = arith.mulf %16, %17 : vector<8x32xf32>
    %23 = arith.addf %21, %22 : vector<8x32xf32>
    %24 = math.tanh %23 : vector<8x32xf32>
    %25 = arith.mulf %24, %19 : vector<8x32xf32>
    %26 = tpu.concatenate %25, %23 in 1 : vector<8x32xf32>, vector<8x32xf32> -> vector<8x64xf32>
    %c0_8 = arith.constant 0 : index
    %c0_9 = arith.constant 0 : index
    %27 = vector.load %arg4[%c0_8, %c0_9] : memref<8x64xf32, #tpu.memory_space<vmem>>, vector<8x64xf32>
    tpu.vector_store %arg4[%c0_8, %c0_9], %26 {strides = array<i32>} : memref<8x64xf32, #tpu.memory_space<vmem>>, vector<8x64xf32>,
    return
  }
}

</mosaic_0001>

<bundles_post_ra>
// kernel: tpu_custom_call.1
= control target key start
LH: loop header
LB: loop body
LE: loop exit
PB: predicated region body
PF: predicated region fallthrough
CT: control target
= control target key end

     0   :  { %9 = vsyncpa [#allocation3], 0  ;;  %s430_s0 = inlined_call_operand.hbm [shape: f32[8,48], index: 0, kind: input, shape index: {}]   ;;  %s431_s1 = inlined_call_operand.hbm [shape: f32[8,32], index: 1, kind: input, shape index: {}]   ;;  %s432_s2 = inlined_call_operand.hbm [shape: f32[48,128], index: 2, kind: input, shape index: {}]   ;;  %s433_s3 = inlined_call_operand.vmem [shape: f32[1,128], index: 3, kind: input, shape index: {}]   ;;  %s434_s4 = inlined_call_operand.hbm [shape: f32[8,64], index: 4, kind: output, shape index: {}]  }
   0x1   :  { %10 = vsyncpa [#allocation6], 0 }
   0x2   :  { %11 = vsyncpa [#allocation4], 0  ;;  %s342_s15 = smov [#allocation5]   ;;  %s343_s17 = smov [#allocation2]  }
   0x3   :  { %s28_s16 = sshll.u32 %s342_s15, 4  ;;  %s18_s18 = sshll.u32 %s343_s17, 4  ;;  %s29_s16 = int_to_ptr.vmem [resolvable:$true] %s28_s16  ;;  %s19_s18 = int_to_ptr.vmem [resolvable:$true] %s18_s18 }
   0x4   :  { %s248_s21 = scalar_lea.hbm %s431_s1, 128 }
   0x5   :  { %p249_p0 = scmp.ne.s32.totalorder %s431_s1, %s248_s21  ;;  %p252_p1 = scmp.lt.u32.totalorder %s248_s21, %s431_s1 }
   0x7   :  { %p254_p2 = pnand %p252_p1, %p249_p0 }
   0x9   :  { %257 = shalt.err (!%p254_p2)
}
   0xa   :  { %s258_s26 = scalar_lea.vmem %s29_s16, 128  ;;  %p263_p4 = scmp.lt.s32.totalorder %s29_s16, %s29_s16 }
   0xb   :  { %p259_p3 = scmp.ne.s32.totalorder %s29_s16, %s258_s26  ;;  %p264_p5 = scmp.lt.s32.totalorder %s258_s26, %s258_s26 }
   0xd   :  { %p265_p6 = por %p264_p5, %p263_p4 }
   0xf   :  { %p266_p7 = pnand %p265_p6, %p259_p3 }
  0x11   :  { %269 = shalt.err (!%p266_p7)
}
  0x12   :  { %31 = dma.hbm_to_vmem [thread:$0]  %s431_s1, 128, %s29_s16, [#allocation6]  }
  0x13   :  { %s270_s5 = scalar_lea.hbm %s430_s0, 128 }
  0x14   :  { %p271_p8 = scmp.ne.s32.totalorder %s430_s0, %s270_s5  ;;  %p274_p9 = scmp.lt.u32.totalorder %s270_s5, %s430_s0 }
  0x16   :  { %p276_p10 = pnand %p274_p9, %p271_p8 }
  0x18   :  { %279 = shalt.err (!%p276_p10)
}
  0x19   :  { %s280_s10 = scalar_lea.vmem %s19_s18, 128  ;;  %p285_p12 = scmp.lt.s32.totalorder %s19_s18, %s19_s18 }
  0x1a   :  { %p281_p11 = scmp.ne.s32.totalorder %s19_s18, %s280_s10  ;;  %p286_p13 = scmp.lt.s32.totalorder %s280_s10, %s280_s10 }
  0x1c   :  { %p287_p0 = por %p286_p13, %p285_p12 }
  0x1e   :  { %p288_p1 = pnand %p287_p0, %p281_p11 }
  0x20   :  { %291 = shalt.err (!%p288_p1)
}
  0x21   :  { %21 = dma.hbm_to_vmem [thread:$0]  %s430_s0, 128, %s19_s18, [#allocation3]  }
  0x22   :  { %s344_s12 = smov [#allocation7]   ;;  %s292_s16 = scalar_lea.hbm %s432_s2, 768 }
  0x23   :  { %s37_s13 = sshll.u32 %s344_s12, 4  ;;  %p293_p2 = scmp.ne.s32.totalorder %s432_s2, %s292_s16  ;;  %s38_s13 = int_to_ptr.vmem [resolvable:$true] %s37_s13 }
  0x24   :  { %p296_p3 = scmp.lt.u32.totalorder %s292_s16, %s432_s2 }
  0x26   :  { %p298_p4 = pnand %p296_p3, %p293_p2 }
  0x28   :  { %301 = shalt.err (!%p298_p4)
}
  0x29   :  { %s302_s22 = scalar_lea.vmem %s38_s13, 768  ;;  %p307_p6 = scmp.lt.s32.totalorder %s38_s13, %s38_s13 }
  0x2a   :  { %p303_p5 = scmp.ne.s32.totalorder %s38_s13, %s302_s22  ;;  %p308_p7 = scmp.lt.s32.totalorder %s302_s22, %s302_s22 }
  0x2c   :  { %p309_p8 = por %p308_p7, %p307_p6 }
  0x2e   :  { %p310_p9 = pnand %p309_p8, %p303_p5 }
  0x30   :  { %313 = shalt.err (!%p310_p9)
}
  0x31   :  { %s345_s0 = smov 128   ;;  %s346_s18 = smov 8  }
  0x32   :  { %43 = dma.hbm_to_vmem [thread:$0]  %s432_s2, 768, %s38_s13, [#allocation6], %s345_s0, %s345_s0, %s346_s18  }
  0x33   :  { %336 = dma.done.wait [#allocation3], 128  }
  0x34   :  { %337 = vsyncadd [#allocation3], 4294967168 }
  0x35   :  { %338 = dma.done.wait [#allocation6], 896  }
  0x36   :  { %339 = vsyncadd [#allocation6], 4294966400  ;;  %v347_v0 = vmov 0.0|0.0   ;;  %vm348_vm0 = vmmov 0   ;;  %v349_v1 = vmov 0.0   ;;  %v56_v2 = vld [vmem:[#allocation7] sm:$0xff]  ;;  %v143_v19 = vlaneseq }
  0x37   :  { %219 = vmatprep.subr.bf16.mxu0 %v347_v0  ;;  %216 = vmatprep.mubr.msk.f32.mxu0 %vm348_vm0, %v349_v1  ;;  %v57_v3 = vld [vmem:[#allocation7 + $0x8] sm:$0xff]  ;;  %v58_v4 = vld [vmem:[#allocation7 + $0x10] sm:$0xff]  ;;  %v59_v6 = vld [vmem:[#allocation7 + $0x18] sm:$0xff]  ;;  %vm69_vm1 = vcmask 392192   ;;  %s350_s26 = smov 32   ;;  %s351_s27 = smov 64  }
  0x38   :  { %v220_v5 = vpack.c.bf16 %v57_v3, %v56_v2  ;;  %v223_v7 = vpack.c.bf16 %v59_v6, %v58_v4  ;;  %v60_v8 = vld [vmem:[#allocation7 + $0x20] sm:$0xff]  ;;  %v61_v9 = vld [vmem:[#allocation7 + $0x28] sm:$0xff]  ;;  %v55_v11 = vld [vmem:[#allocation2] sm:$0xff]  ;;  %v144_v20 = vand.u32 127, %v143_v19  ;;  %s353_s28 = smov [#allocation8]   ;;  %vm174_vm3 = vcmask 261120  }
  0x39   :  { %v226_v10 = vpack.c.bf16 %v61_v9, %v60_v8  ;;  %v194_v12 = vld [vmem:[%s433_s3] ss:$0 sm:$0xff]  ;;  %s352_s3 = smov 96   ;;  %v154_v25 = vld [vmem:[#allocation5] sm:$0xff]  ;;  %s184_s29 = sshll.u32 %s353_s28, 4  ;;  %vm176_vm4 = vcmask 523264   ;;  %s185_s29 = int_to_ptr.vmem [resolvable:$true] %s184_s29 }
  0x3a   :  { %221 = vmatpush3.bf16.msra.mxu0 %v220_v5  ;;  %vm145_vm2 = vcmp.lt.s32.totalorder %v144_v20, 32  ;;  %s314_s30 = scalar_lea.vmem %s185_s29, 128  ;;  %p319_p11 = scmp.lt.s32.totalorder %s185_s29, %s185_s29 }
  0x3b   :  { %222 = vmatprep.subr.bf16.mxu0 %v347_v0  ;;  %p315_p10 = scmp.ne.s32.totalorder %s185_s29, %s314_s30  ;;  %p320_p12 = scmp.lt.s32.totalorder %s314_s30, %s314_s30 }
  0x3d   :  { %p321_p13 = por %p320_p12, %p319_p11 }
  0x3e   :  { %224 = vmatpush3.bf16.msra.mxu0 %v223_v7 }
  0x3f   :  { %225 = vmatprep.subr.bf16.mxu0 %v347_v0  ;;  %p322_p0 = pnand %p321_p13, %p315_p10 }
  0x42   :  { %227 = vmatpush3.bf16.msra.mxu0 %v226_v10 }
  0x45   :  { %217 = vmatmul.mubr.msk.f32.vlgmr.msra.gmra.mrb[0].mxu0 %vm69_vm1, %v55_v11 }
 0x118   :  { %v139_v13 = vpop.f32.mrb[0].mxu0 }
 0x119   :  { %v140_v14 = vadd.f32 %v194_v12, %v139_v13  ;;  %v218_v15 = vpop.f32.mrb[1].mxu0 }
 0x11b   :  { %v196_v16 = vmul.f32 -1.442695, %v140_v14 }
 0x11d   :  { %240 = vpow2.f32 %v196_v16 }
 0x11e   :  { %242 = vtanh.f32 %v140_v14 }
 0x127   :  { %v241_v17 = vpop.eup %240 }
 0x128   :  { %v150_v18 = vadd.f32 1.0, %v241_v17  ;;  %v243_v21 = vpop.eup %242 }
 0x12a   :  { %244 = vrcp.f32 %v150_v18 }
 0x134   :  { %v245_v22 = vpop.eup %244 }
 0x135   :  { %v153_v23 = vsel %vm145_vm2, %v243_v21, %v245_v22 }
 0x136   :  { %166 = vrot.lane.b32.xlu1 %v153_v23, %s350_s26  ;;  %156 = vrot.lane.b32.xlu0 %v153_v23, %s351_s27 }
 0x13a   :  { %160 = vrot.lane.b32.xlu0 %v153_v23, %s352_s3 }
 0x1a8   :  { %v157_v24 = vpop.permute.xlu0 %156  ;;  %v167_v31 = vpop.permute.xlu1 %166 }
 0x1a9   :  { %v159_v27 = vmul.f32 %v157_v24, %v154_v25 }
 0x1ac   :  { %v161_v26 = vpop.permute.xlu0 %160 }
 0x1ad   :  { %v163_v28 = vmul.f32 %v161_v26, %v153_v23 }
 0x1af   :  { %v164_v29 = vadd.f32 %v163_v28, %v159_v27 }
 0x1b1   :  { %171 = vrot.lane.b32.xlu1 %v164_v29, %s350_s26  ;;  %246 = vtanh.f32 %v164_v29 }
 0x1bb   :  { %v247_v30 = vpop.eup %246 }
 0x1bc   :  { %v169_v32 = vmul.f32 %v247_v30, %v167_v31 }
 0x223   :  { %v172_v33 = vpop.permute.xlu1 %171 }
 0x224   :  { %v175_v34 = vsel %vm174_vm3, %v169_v32, %v172_v33 }
 0x225   :  { %177 = vst.msk [vmem:[#allocation8] sm:$0xff] %vm176_vm4, %v175_v34 }
 0x226   :  { %325 = shalt.err (!%p322_p0)
}
 0x227   :  { %s326_s7 = scalar_lea.hbm %s434_s4, 128 }
 0x228   :  { %p327_p1 = scmp.ne.s32.totalorder %s434_s4, %s326_s7  ;;  %p330_p2 = scmp.lt.u32.totalorder %s326_s7, %s434_s4 }
 0x22a   :  { %p332_p3 = pnand %p330_p2, %p327_p1 }
 0x22c   :  { %335 = shalt.err (!%p332_p3)
}
 0x22d   :  { %187 = dma.vmem_to_hbm [thread:$0]  %s185_s29, 128, %s434_s4, [#allocation4]  }
 0x22e   :  { %340 = dma.done.wait [#allocation4], 128  }
 0x22f   :  { %341 = vsyncadd [#allocation4], 4294967168 }
 0x230   :  { %191 = vsyncpa [#allocation3], 1 }
 0x231   :  { %192 = vsyncpa [#allocation6], 1 }
 0x232   :  { %193 = vsyncpa [#allocation4], 1 }

</bundles_post_ra>
